<compile_context>
chip_gen: v7x
topology: tpu7x:2x2x1
jax: 0.10.0
libtpu: 0.0.40
codegen_flags: <defaults>
</compile_context>

<pallas_src>
import math

import jax
import jax.numpy as jnp
from jax.experimental import pallas as pl
from jax.experimental.pallas import tpu as pltpu

LANE = 128
VMEM_LIMIT = 48 * 1024 * 1024  # raise v5e/v6e scoped default, < v7x 64 MiB


def _round_up(x, m):
    return ((x + m - 1) // m) * m


def _pad2(a, rows, cols):
    return jnp.pad(a, ((0, rows - a.shape[0]), (0, cols - a.shape[1])))


def _l2_normalize(h):
    # matches torch.nn.functional.normalize(p=2, dim=-1, eps=1e-12); padded
    # columns are exactly zero so they do not perturb the norm.  rsqrt goes to
    # the EUP slot (free next to the epilogue MXU/VPU work).
    sumsq = jnp.sum(h * h, axis=-1, keepdims=True)
    return h * jax.lax.rsqrt(jnp.maximum(sumsq, 1e-24))


def _counts_bf16(counts_ref):
    # int8 -> f32 -> bf16: conservative two-step cast (exact for counts <= 127).
    return counts_ref[...].astype(jnp.float32).astype(jnp.bfloat16)


# --------------------------------------------------------------------------
# Pre-projection: xproj = x @ W1l  (streamed neighbor slab for layer 1)
# --------------------------------------------------------------------------
def proj_kernel(x_ref, w_ref, o_ref):
    o_ref[...] = jnp.dot(x_ref[...], w_ref[...],
                         preferred_element_type=jnp.float32).astype(o_ref.dtype)


# --------------------------------------------------------------------------
# Layer 1: mean-aggregate(pre-projected) + self path -> L2 norm -> ReLU -> BN
#          also emits tproj = t @ W2l for layer 2's neighbor slab.
# --------------------------------------------------------------------------
def conv1_kernel(
    counts_ref,   # [tm, tk]   int8  un-normalized adjacency tile
    xpk_ref,      # [tk, Hp]   bf16  pre-projected neighbor slab (x @ W1l)
    xi_ref,       # [tm, Fp]   bf16  self features (row tile)
    invdeg_ref,   # [tm, 1]    f32   1 / max(deg, 1)
    w1r_ref,      # [Fp, Hp]   bf16
    b1_ref,       # [1, Hp]    f32
    bns_ref,      # [1, Hp]    f32   folded BN scale
    bnb_ref,      # [1, Hp]    f32   folded BN shift
    w2l_ref,      # [Hp, Hp]   bf16  (for tproj)
    t_ref,        # [tm, Hp]   bf16  output: post-transition features
    tproj_ref,    # [tm, Hp]   bf16  output: t @ W2l
    acc_ref,      # [tm, Hp]   f32   aggregation accumulator (scratch)
    self_ref,     # [tm, Hp]   f32   self-path scratch
):
    k = pl.program_id(1)

    @pl.when(k == 0)
    def _():
        acc_ref[...] = jnp.zeros_like(acc_ref)
        # self path hoisted to k==0 so it hides under the counts/slab DMAs
        self_ref[...] = jnp.dot(xi_ref[...], w1r_ref[...],
                                preferred_element_type=jnp.float32)

    acc_ref[...] += jnp.dot(_counts_bf16(counts_ref), xpk_ref[...],
                            preferred_element_type=jnp.float32)

    @pl.when(k == pl.num_programs(1) - 1)
    def _():
        # (counts @ (x @ W1l)) * invdeg == mean_agg(x) @ W1l  (linearity)
        h = acc_ref[...] * invdeg_ref[...] + self_ref[...] + b1_ref[...]
        h = _l2_normalize(h)                                   # normalize=True
        t = jnp.maximum(h, 0.0) * bns_ref[...] + bnb_ref[...]  # ReLU -> BN(eval)
        t_bf = t.astype(t_ref.dtype)                           # Dropout(eval)=id
        t_ref[...] = t_bf
        tproj_ref[...] = jnp.dot(t_bf, w2l_ref[...],
                                 preferred_element_type=jnp.float32
                                 ).astype(tproj_ref.dtype)


# --------------------------------------------------------------------------
# Layer 2: mean-aggregate(pre-projected) + self path -> L2 norm -> fc
# --------------------------------------------------------------------------
def conv2_fc_kernel(
    counts_ref,   # [tm, tk]   int8
    tpk_ref,      # [tk, Hp]   bf16  pre-projected neighbor slab (t @ W2l)
    ti_ref,       # [tm, Hp]   bf16  self t rows
    invdeg_ref,   # [tm, 1]    f32
    w2r_ref,      # [Hp, Hp]   bf16
    b2_ref,       # [1, Hp]    f32
    wfc_ref,      # [Hp, Cp]   bf16
    bfc_ref,      # [1, Cp]    f32
    o_ref,        # [tm, Cp]   f32
    acc_ref,      # [tm, Hp]   f32
    self_ref,     # [tm, Hp]   f32
):
    k = pl.program_id(1)

    @pl.when(k == 0)
    def _():
        acc_ref[...] = jnp.zeros_like(acc_ref)
        self_ref[...] = jnp.dot(ti_ref[...], w2r_ref[...],
                                preferred_element_type=jnp.float32)

    acc_ref[...] += jnp.dot(_counts_bf16(counts_ref), tpk_ref[...],
                            preferred_element_type=jnp.float32)

    @pl.when(k == pl.num_programs(1) - 1)
    def _():
        h = acc_ref[...] * invdeg_ref[...] + self_ref[...] + b2_ref[...]
        h = _l2_normalize(h)
        o_ref[...] = (jnp.dot(h.astype(jnp.bfloat16), wfc_ref[...],
                              preferred_element_type=jnp.float32) + bfc_ref[...])


def sage_forward(x, edge_index, params, *, tm=256, tk=256):
    """x: [N, nfeat] float32, edge_index: [2, E] int32 (row 0 = src, row 1 = dst).

    tm/tk default to 256 to match the 256x256 MXU on v6e/v7x and amortize
    per-step overhead; v5e maps 256 tiles fine onto its 4x128x128 MXU.
    """
    n, f = x.shape
    h = params["w1l"].shape[1]
    c = params["wfc"].shape[1]

    n_pad = _round_up(n, math.lcm(tm, tk))   # divisible by both tm and tk
    fp = _round_up(f, LANE)
    hp = _round_up(h, LANE)
    cp = _round_up(c, LANE)

    # ---- glue: int8 counts (exact for multiplicity <= 127) + inverse degree --
    src, dst = edge_index[0], edge_index[1]
    counts = jnp.zeros((n_pad, n_pad), jnp.int8).at[dst, src].add(jnp.int8(1))
    deg = jnp.zeros((n_pad,), jnp.float32).at[dst].add(1.0).reshape(n_pad, 1)
    inv_deg = 1.0 / jnp.maximum(deg, 1.0)                        # [n_pad, 1] f32

    xp = _pad2(x, n_pad, fp).astype(jnp.bfloat16)

    w1l = _pad2(params["w1l"], fp, hp).astype(jnp.bfloat16)
    w1r = _pad2(params["w1r"], fp, hp).astype(jnp.bfloat16)
    b1 = _pad2(params["b1"], 1, hp)
    w2l = _pad2(params["w2l"], hp, hp).astype(jnp.bfloat16)
    w2r = _pad2(params["w2r"], hp, hp).astype(jnp.bfloat16)
    b2 = _pad2(params["b2"], 1, hp)
    wfc = _pad2(params["wfc"], hp, cp).astype(jnp.bfloat16)
    bfc = _pad2(params["bfc"], 1, cp)

    # Fold BatchNorm1d (eval) into a single affine.
    bn_scale = params["bn_g"] * jax.lax.rsqrt(params["bn_var"] + 1e-5)
    bn_shift = params["bn_b"] - params["bn_mu"] * bn_scale
    bn_scale = _pad2(bn_scale, 1, hp)
    bn_shift = _pad2(bn_shift, 1, hp)

    rows = n_pad // tm
    grid = (rows, n_pad // tk)
    cparams = pltpu.CompilerParams(
        dimension_semantics=("parallel", "arbitrary"),
        vmem_limit_bytes=VMEM_LIMIT)
    proj_cparams = pltpu.CompilerParams(
        dimension_semantics=("parallel",),
        vmem_limit_bytes=VMEM_LIMIT)

    def full(shape):
        return pl.BlockSpec(shape, lambda i, k: (0, 0))

    # ---- pre-projection: xproj = x @ W1l ----
    xproj = pl.pallas_call(
        proj_kernel,
        out_shape=jax.ShapeDtypeStruct((n_pad, hp), jnp.bfloat16),
        grid_spec=pltpu.PrefetchScalarGridSpec(
            num_scalar_prefetch=0,
            grid=(rows,),
            in_specs=[
                pl.BlockSpec((tm, fp), lambda i: (i, 0)),
                pl.BlockSpec((fp, hp), lambda i: (0, 0)),
            ],
            out_specs=pl.BlockSpec((tm, hp), lambda i: (i, 0)),
        ),
        compiler_params=proj_cparams,
    )(xp, w1l)

    # ---- layer 1 (also emits tproj = t @ W2l for layer 2) ----
    t, tproj = pl.pallas_call(
        conv1_kernel,
        out_shape=(jax.ShapeDtypeStruct((n_pad, hp), jnp.bfloat16),
                   jax.ShapeDtypeStruct((n_pad, hp), jnp.bfloat16)),
        grid_spec=pltpu.PrefetchScalarGridSpec(
            num_scalar_prefetch=0,
            grid=grid,
            in_specs=[
                pl.BlockSpec((tm, tk), lambda i, k: (i, k)),   # counts tile
                pl.BlockSpec((tk, hp), lambda i, k: (k, 0)),   # xproj, K slab
                pl.BlockSpec((tm, fp), lambda i, k: (i, 0)),   # x, self rows
                pl.BlockSpec((tm, 1), lambda i, k: (i, 0)),    # inv degree
                full((fp, hp)),                                # W1r
                full((1, hp)),                                 # b1
                full((1, hp)),                                 # bn scale
                full((1, hp)),                                 # bn shift
                full((hp, hp)),                                # W2l
            ],
            out_specs=[pl.BlockSpec((tm, hp), lambda i, k: (i, 0)),
                       pl.BlockSpec((tm, hp), lambda i, k: (i, 0))],
            scratch_shapes=[pltpu.VMEM((tm, hp), jnp.float32),
                            pltpu.VMEM((tm, hp), jnp.float32)],
        ),
        compiler_params=cparams,
    )(counts, xproj, xp, inv_deg, w1r, b1, bn_scale, bn_shift, w2l)

    # ---- layer 2 + fc ----
    out = pl.pallas_call(
        conv2_fc_kernel,
        out_shape=jax.ShapeDtypeStruct((n_pad, cp), jnp.float32),
        grid_spec=pltpu.PrefetchScalarGridSpec(
            num_scalar_prefetch=0,
            grid=grid,
            in_specs=[
                pl.BlockSpec((tm, tk), lambda i, k: (i, k)),   # counts tile
                pl.BlockSpec((tk, hp), lambda i, k: (k, 0)),   # tproj, K slab
                pl.BlockSpec((tm, hp), lambda i, k: (i, 0)),   # t, self rows
                pl.BlockSpec((tm, 1), lambda i, k: (i, 0)),    # inv degree
                full((hp, hp)),                                # W2r
                full((1, hp)),                                 # b2
                full((hp, cp)),                                # Wfc
                full((1, cp)),                                 # bfc
            ],
            out_specs=pl.BlockSpec((tm, cp), lambda i, k: (i, 0)),
            scratch_shapes=[pltpu.VMEM((tm, hp), jnp.float32),
                            pltpu.VMEM((tm, hp), jnp.float32)],
        ),
        compiler_params=cparams,
    )(counts, tproj, t, inv_deg, w2r, b2, wfc, bfc)

    return out[:n, :c]


# --------------------------------------------------------------------------
# Parameter init (matches torch xavier_uniform_ on Linear weights, zero bias)
# --------------------------------------------------------------------------
def _xavier_uniform(key, fan_in, fan_out):
    bound = (6.0 / (fan_in + fan_out)) ** 0.5
    # stored [in, out] so the kernel does x @ W (equivalent to torch x @ W.T)
    return jax.random.uniform(key, (fan_in, fan_out), jnp.float32, -bound, bound)


def init_params(key, nfeat, nhid, nclass):
    k = jax.random.split(key, 5)
    return {
        "w1l": _xavier_uniform(k[0], nfeat, nhid),
        "b1": jnp.zeros((1, nhid), jnp.float32),
        "w1r": _xavier_uniform(k[1], nfeat, nhid),
        "bn_g": jnp.ones((1, nhid), jnp.float32),
        "bn_b": jnp.zeros((1, nhid), jnp.float32),
        "bn_mu": jnp.zeros((1, nhid), jnp.float32),
        "bn_var": jnp.ones((1, nhid), jnp.float32),
        "w2l": _xavier_uniform(k[2], nhid, nhid),
        "b2": jnp.zeros((1, nhid), jnp.float32),
        "w2r": _xavier_uniform(k[3], nhid, nhid),
        "wfc": _xavier_uniform(k[4], nhid, nclass),
        "bfc": jnp.zeros((1, nclass), jnp.float32),
    }


# Pure-JAX f32 reference of the same forward (eval-mode BN / Dropout).
def sage_reference(x, edge_index, params):
    n = x.shape[0]
    src, dst = edge_index[0], edge_index[1]
    counts = jnp.zeros((n, n), jnp.float32).at[dst, src].add(1.0)
    deg = counts.sum(-1, keepdims=True)
    agg = (counts @ x) / jnp.maximum(deg, 1.0)
    h = agg @ params["w1l"] + params["b1"] + x @ params["w1r"]
    h = h / jnp.maximum(jnp.linalg.norm(h, axis=-1, keepdims=True), 1e-12)
    t = jnp.maximum(h, 0.0)
    t = ((t - params["bn_mu"]) * jax.lax.rsqrt(params["bn_var"] + 1e-5)
         * params["bn_g"] + params["bn_b"])
    agg2 = (counts @ t) / jnp.maximum(deg, 1.0)
    h2 = agg2 @ params["w2l"] + params["b2"] + t @ params["w2r"]
    h2 = h2 / jnp.maximum(jnp.linalg.norm(h2, axis=-1, keepdims=True), 1e-12)
    return h2 @ params["wfc"] + params["bfc"]


if __name__ == "__main__":
    # Small but multi-tile problem: N=300 nodes -> padded to 512 -> 2x2 grid.
    N, NFEAT, NHID, NCLASS, E = 300, 48, 64, 7, 1200

    key = jax.random.PRNGKey(0)
    kx, ke, kp = jax.random.split(key, 3)

    x = jax.random.normal(kx, (N, NFEAT), jnp.float32)
    edge_index = jax.random.randint(ke, (2, E), 0, N, jnp.int32)
    params = init_params(kp, NFEAT, NHID, NCLASS)

    out = sage_forward(x, edge_index, params)
    jax.block_until_ready(out)
    assert out.shape == (N, NCLASS)

    ref = sage_reference(x, edge_index, params)
    max_err = float(jnp.max(jnp.abs(out - ref)))
    # Generous tolerance: matmuls run in bf16 (f32 accumulation).
    assert max_err < 0.5, f"max abs error vs f32 reference too large: {max_err}"

    print("KERNEL_OK")
</pallas_src>

<mosaic_0001>
module attributes {stable_mosaic.version = 11 : i64} {
  func.func @proj_kernel(%arg0: i32, %arg1: memref<256x128xbf16, #tpu.memory_space<vmem>>, %arg2: memref<128x128xbf16, #tpu.memory_space<vmem>>, %arg3: memref<256x128xbf16, #tpu.memory_space<vmem>>) attributes {dimension_semantics = [#tpu.dimension_semantics<parallel>], iteration_bounds = array<i64: 2>, scalar_prefetch = 0 : i64, scratch_operands = 0 : i64, tpu.core_type = #tpu.core_type<tc>, window_params = [{transform_indices = @transform_0, window_bounds = array<i64: 256, 128>}, {pipeline_mode = #tpu.pipeline_mode<synchronous>, transform_indices = @transform_1, window_bounds = array<i64: 128, 128>}, {transform_indices = @transform_2, window_bounds = array<i64: 256, 128>}]} {
    %c0 = arith.constant 0 : index
    %c0_0 = arith.constant 0 : index
    %0 = vector.load %arg1[%c0, %c0_0] : memref<256x128xbf16, #tpu.memory_space<vmem>>, vector<256x128xbf16>
    %c0_1 = arith.constant 0 : index
    %c0_2 = arith.constant 0 : index
    %1 = vector.load %arg2[%c0_1, %c0_2] : memref<128x128xbf16, #tpu.memory_space<vmem>>, vector<128x128xbf16>
    %cst = arith.constant dense<0.000000e+00> : vector<256x128xf32>
    %2 = tpu.matmul %0, %1, %cst {dimension_numbers = #tpu.dot_dimension_numbers<[1], [0], [0], [1], [0, 0, 1, 1], [], []>} : vector<256x128xbf16>, vector<128x128xbf16>, vector<256x128xf32> -> vector<256x128xf32>
    %3 = arith.truncf %2 : vector<256x128xf32> to vector<256x128xbf16>
    %c0_3 = arith.constant 0 : index
    %c0_4 = arith.constant 0 : index
    %4 = vector.load %arg3[%c0_3, %c0_4] : memref<256x128xbf16, #tpu.memory_space<vmem>>, vector<256x128xbf16>
    tpu.vector_store %arg3[%c0_3, %c0_4], %3 {strides = array<i32>} : memref<256x128xbf16, #tpu.memory_space<vmem>>, vector<256x128xbf16>,
    return
  }
  func.func @transform_0(%arg0: i32) -> (i32, i32) {
    %c0_i32 = arith.constant 0 : i32
    %c0_i32_0 = arith.constant 0 : i32
    return %arg0, %c0_i32 : i32, i32
  }
  func.func @transform_1(%arg0: i32) -> (i32, i32) {
    %c0_i32 = arith.constant 0 : i32
    %c0_i32_0 = arith.constant 0 : i32
    %c0_i32_1 = arith.constant 0 : i32
    return %c0_i32, %c0_i32_0 : i32, i32
  }
  func.func @transform_2(%arg0: i32) -> (i32, i32) {
    %c0_i32 = arith.constant 0 : i32
    %c0_i32_0 = arith.constant 0 : i32
    return %arg0, %c0_i32 : i32, i32
  }
}

</mosaic_0001>

<bundles_post_ra>
// kernel: tpu_custom_call.1
= control target key start
LH: loop header
LB: loop body
LE: loop exit
PB: predicated region body
PF: predicated region fallthrough
CT: control target
= control target key end

     0   :  { %7 = vsyncpa [#allocation3], 0  ;;  %s1564_s0 = inlined_call_operand.hbm [shape: bf16[512,128], index: 0, kind: input, shape index: {}]   ;;  %s1565_s1 = inlined_call_operand.hbm [shape: bf16[128,128], index: 1, kind: input, shape index: {}]   ;;  %s1566_s2 = inlined_call_operand.hbm [shape: bf16[512,128], index: 2, kind: output, shape index: {}]  }
   0x1   :  { %9 = vsyncpa [#allocation3 + $0x1], 0 }
   0x2   :  { %10 = vsyncpa [#allocation6], 0 }
   0x3   :  { %11 = vsyncpa [#allocation4], 0 }
   0x4   :  { %13 = vsyncpa [#allocation4 + $0x1], 0  ;;  %s1316_s9 = smov 0   ;;  %s1318_s10 = smov 0  }
   0x5   :  { %s1320_s11 = smov 0   ;;  %s1322_s12 = smov 0  }
   0x6 LB: > { %s1337_s13 = sadd.s32 4294967295, %s1292_s12   ;;  %s790_s14 = sadd.s32 4294967294, %s1292_s12   ;;  %s1292_s12 = sphi %s1322_s12, %s1586_s12   ;;  %s1288_s11 = sphi %s1320_s11, %s1585_s11   ;;  %s1284_s10 = sphi %s1318_s10, %s1584_s10   ;;  %s1280_s9 = sphi %s1316_s9, %s1583_s9  }
   0x7   : > { %p39_p0 = scmp.ne.s32.totalorder %s1284_s10, %s1280_s9  ;;  %p1567_p1 = scmp.eq.s32.totalorder %s1337_s13, 0 }
   0x8   : > { %p90_p3 = scmp.eq.s32.totalorder %s790_s14, 1  ;;  %p791_p5 = scmp.ge.s32.totalorder %s1292_s12, 1 }
   0x9   : > { %p1346_p4 = por %p1567_p1, %p39_p0  ;;  %p97_p7 = scmp.lt.s32.totalorder %s1292_s12, 3 }
   0xa   : > { %p1351_p6 = por %p90_p3, %p39_p0  ;;  %s1294_s18 = smov [#allocation5]  }
   0xb   : > { %s1570_s15 = scalar_select %p1346_p4, 1, 0 }
   0xc   : > { %s1571_s16 = scalar_select %p1351_p6, 1, 0 }
   0xd   : > { %p1356_p8 = pnand %p791_p5, %p97_p7  ;;  %s109_s19 = sshll.u32 %s1294_s18, 4  ;;  %s1360_s19 = int_to_ptr.vmem [resolvable:$true] %s109_s19 }
   0xe   : > { %s1372_s21 = sadd.s32 1, %s1292_s12   ;;  %s26_s22 = sadd.s32 1, %s1288_s11 }
   0xf   : > { %s1572_s17 = scalar_select %p1356_p8, 1, 0 }
  0x10   : > { %p1087_p9 = pneg %p1356_p8  ;;  %s23_s23 = ssub.s32 %s1292_s12, %s1372_s21 }
  0x11   : > { %s1164_s26 = scalar_lea.hbm %s1565_s1, 1024 }
  0x12   : > { %p1367_p11 = pnand %p1087_p9, %p1567_p1  ;;  %p1165_p12 = scmp.ne.s32.totalorder %s1565_s1, %s1164_s26 }
  0x13   : > { %p1171_p5 = scmp.lt.u32.totalorder %s1164_s26, %s1565_s1 }
  0x14   : > { %p1166_p13 = pneg %p1367_p11 }
  0x16   : > { %p1167_p0 = pnand %p1166_p13, %p1165_p12 }
  0x18   : > { %p1168_p3 = pneg %p1167_p0 }
  0x1a   : > { %p1173_p7 = pnand %p1171_p5, %p1168_p3 }
  0x1c   : > { %1176 = shalt.err (!%p1173_p7)
}
  0x1d   : > { %s1177_s3 = scalar_lea.vmem %s1360_s19, 1024  ;;  %p1185_p2 = scmp.lt.s32.totalorder %s1360_s19, %s1360_s19 }
  0x1e   : > { %p1178_p9 = scmp.ne.s32.totalorder %s1360_s19, %s1177_s3  ;;  %p1186_p6 = scmp.lt.s32.totalorder %s1177_s3, %s1177_s3 }
  0x20   : > { %p1180_p10 = pnand %p1178_p9, %p1166_p13  ;;  %p1187_p4 = por %p1186_p6, %p1185_p2 }
  0x22   : > { %p1181_p1 = pneg %p1180_p10 }
  0x24   : > { %p1188_p8 = pnand %p1187_p4, %p1181_p1 }
  0x26   : > { %1191 = shalt.err (!%p1188_p8)
}
  0x27   : > { %s1295_s4 = smov 64   ;;  %s1296_s5 = smov 4  }
  0x28   : > { %1090 = dma.hbm_to_vmem [thread:$0]  (!%p1367_p11), %s1565_s1, 1024, %s1360_s19, [#allocation6], %s1295_s4, %s1295_s4, %s1296_s5  }
  0x29   : > { %p24_p1 = scmp.eq.s32.totalorder %s23_s23, 0  ;;  %p33_p2 = scmp.ne.s32.totalorder %s1288_s11, %s1284_s10 }
  0x2a   : > { %p34_p4 = scmp.eq.s32.totalorder %s1292_s12, 0  ;;  %p1100_p6 = scmp.lt.s32.totalorder %s1292_s12, 2 }
  0x2b   : > { %s1406_s8 = scalar_select %p24_p1, %s1288_s11, %s26_s22  }
  0x2c   : > { %p35_p8 = por %p34_p4, %p33_p2  ;;  %p1574_p10 = scmp.eq.s32.totalorder %s1337_s13, 1 }
  0x2d   : > { %s123_s18 = sand.u32 1, %s1288_s11   ;;  %s862_s20 = sshll.u32 %s1292_s12, 11 }
  0x2e   : > { %p1410_p12 = por %p1574_p10, %p33_p2  ;;  %s794_s24 = sshll.u32 %s123_s18, 7 }
  0x2f   : > { %s1419_s27 = scalar_lea.hbm %s1564_s0, %s862_s20  ;;  %s127_s19 = scalar_lea.vmem [#allocation2], %s794_s24 }
  0x30   : > { %s134_s22 = sshll.u32 %s127_s19, 4  ;;  %p1421_p11 = pnand %p1100_p6, %p35_p8  ;;  %s1425_s22 = int_to_ptr.vmem [resolvable:$true] %s134_s22 }
  0x31   : > { %s1427_s28 = scalar_lea.sflag [#allocation3], %s123_s18  ;;  %s1192_s29 = scalar_lea.hbm %s1419_s27, 2048 }
  0x32   : > { %p1193_p13 = scmp.ne.s32.totalorder %s1419_s27, %s1192_s29  ;;  %p1194_p0 = pneg %p1421_p11 }
  0x33   : > { %s1197_s6 = scalar_lea.hbm %s1564_s0, 4096  ;;  %p1198_p7 = scmp.lt.u32.totalorder %s1419_s27, %s1564_s0 }
  0x34   : > { %p1195_p3 = pnand %p1194_p0, %p1193_p13  ;;  %p1199_p9 = scmp.lt.u32.totalorder %s1197_s6, %s1192_s29 }
  0x35   : > { %p1201_p2 = scmp.lt.u32.totalorder %s1192_s29, %s1419_s27 }
  0x36   : > { %p1196_p5 = pneg %p1195_p3  ;;  %p1200_p1 = por %p1199_p9, %p1198_p7 }
  0x38   : > { %p1202_p4 = por %p1201_p2, %p1200_p1 }
  0x3a   : > { %p1203_p6 = pnand %p1202_p4, %p1196_p5 }
  0x3c   : > { %1206 = shalt.err (!%p1203_p6)
}
  0x3d   : > { %s1207_s18 = scalar_lea.vmem %s1425_s22, 2048  ;;  %s1297_s24 = smov [#allocation2]  }
  0x3e   : > { %p1208_p8 = scmp.ne.s32.totalorder %s1425_s22, %s1207_s18  ;;  %s1212_s25 = sshll.u32 %s1297_s24, 4  ;;  %s1213_s25 = int_to_ptr.vmem [resolvable:$false] %s1212_s25 }
  0x3f   : > { %s1214_s26 = scalar_lea.vmem %s1213_s25, 4096  ;;  %p1215_p3 = scmp.lt.s32.totalorder %s1425_s22, %s1213_s25 }
  0x40   : > { %p1210_p10 = pnand %p1208_p8, %p1194_p0  ;;  %p1216_p7 = scmp.lt.s32.totalorder %s1214_s26, %s1207_s18 }
  0x42   : > { %p1211_p13 = pneg %p1210_p10  ;;  %p1217_p9 = por %p1216_p7, %p1215_p3 }
  0x44   : > { %p1218_p1 = pnand %p1217_p9, %p1211_p13 }
  0x46   : > { %1221 = shalt.err (!%p1218_p1)
}
  0x47   : > { %1094 = dma.hbm_to_vmem [thread:$0]  (!%p1421_p11), %s1419_s27, 2048, %s1425_s22, %s1427_s28, %s1295_s4, %s1295_s4, %s1296_s5  }
  0x48   : > { %p1577_p0 = scmp.ne.s32.totalorder %s1572_s17, 0 }
  0x49   : > { %s1461_s19 = sand.u32 (!%p1577_p0), 1, %s1284_s10   ;;  %p1578_p5 = scmp.ne.s32.totalorder (!%p1577_p0), %s1570_s15, 0 }
  0x4a   : > { %146 = sbr.rel (%p1577_p0) target bundleno = 374 (0x176), region = 28  ;;  %s798_s29 = sshll.u32 (!%p1577_p0), %s1461_s19, 7 }
  0x4b   : > { %s149_s30 = scalar_lea.sflag (!%p1577_p0), [#allocation3], %s1461_s19  ;;  %s1467_s23 = scalar_lea.vmem (!%p1577_p0), [#allocation2], %s798_s29 }
  0x51   : > { %1267 = dma.done.wait (%p1578_p5), %s149_s30, 2048  }
  0x52   : > { %1269 = vsyncadd (%p1578_p5), %s149_s30, 4294965248  ;;  %p1579_p11 = scmp.eq.s32.totalorder %s1337_s13, 0 }
  0x54   : > { %1271 = dma.done.wait (%p1579_p11), [#allocation6], 1024   ;;  %p1580_p2 = pmov %p1579_p11 }
  0x55   : > { %v1140_v0 = vld [vmem:[#allocation5] sm:$0xff]   ;;  %v1141_v1 = vld [vmem:[#allocation5 + $0x8] sm:$0xff]   ;;  %v1142_v2 = vld [vmem:[#allocation5 + $0x10] sm:$0xff]   ;;  %s1495_s15 = scalar_lea.vmem [#allocation7], %s798_s29  ;;  %s895_s17 = sshll.u32 %s1337_s13, 11 }
  0x56   : > { %1273 = vsyncadd (%p1580_p2), [#allocation6], 4294966272  ;;  %1015 = vmatprep.subr.bf16.mxu0 %v1140_v0  ;;  %1063 = vmatprep.subr.bf16.mxu1 %v1140_v0  ;;  %v1143_v3 = vld [vmem:[#allocation5 + $0x18] sm:$0xff]   ;;  %v1148_v4 = vld [vmem:[%s1467_s23] sm:$0xff]   ;;  %s707_s4 = sshll.u32 %s1495_s15, 4  ;;  %s1514_s22 = scalar_lea.hbm %s1566_s2, %s895_s17  ;;  %s1516_s4 = int_to_ptr.vmem [resolvable:$true] %s707_s4 }
  0x57   : > { %1016 = vmatpush3.bf16.msra.mxu0 %v1140_v0  ;;  %1071 = vmatpush3.bf16.msra.mxu1 %v1140_v0  ;;  %v1149_v5 = vld [vmem:[%s1467_s23 + $0x40] sm:$0xff]   ;;  %v1145_v7 = vld [vmem:[#allocation5 + $0x28] sm:$0xff]   ;;  %v1146_v8 = vld [vmem:[#allocation5 + $0x30] sm:$0xff]   ;;  %s694_s13 = scalar_lea.sflag [#allocation4], %s1461_s19  ;;  %s1222_s28 = scalar_lea.vmem %s1516_s4, 2048 }
  0x58   : > { %1017 = vmatprep.subr.bf16.mxu0 %v1141_v1  ;;  %1064 = vmatprep.subr.bf16.mxu1 %v1141_v1  ;;  %v1144_v6 = vld [vmem:[#allocation5 + $0x20] sm:$0xff]   ;;  %v1147_v9 = vld [vmem:[#allocation5 + $0x38] sm:$0xff]   ;;  %v1150_v10 = vld [vmem:[%s1467_s23 + $0x8] sm:$0xff]   ;;  %p1223_p4 = scmp.ne.s32.totalorder %s1516_s4, %s1222_s28  ;;  %s1298_s3 = smov [#allocation7]  }
  0x59   : > { %1031 = vmatprep.mubr.bf16.mxu0 %v1148_v4  ;;  %1047 = vmatprep.mubr.bf16.mxu1 %v1149_v5  ;;  %v1151_v11 = vld [vmem:[%s1467_s23 + $0x48] sm:$0xff]   ;;  %v1152_v12 = vld [vmem:[%s1467_s23 + $0x10] sm:$0xff]   ;;  %v1154_v14 = vld [vmem:[%s1467_s23 + $0x18] sm:$0xff]   ;;  %s1226_s6 = sshll.u32 %s1298_s3, 4  ;;  %s1227_s6 = int_to_ptr.vmem [resolvable:$false] %s1226_s6 }
  0x5a   : > { %v1153_v13 = vld [vmem:[%s1467_s23 + $0x50] sm:$0xff]   ;;  %v1155_v15 = vld [vmem:[%s1467_s23 + $0x58] sm:$0xff]   ;;  %v1156_v16 = vld [vmem:[%s1467_s23 + $0x20] sm:$0xff]   ;;  %p1224_p6 = pnand %p1223_p4, %p1410_p12  ;;  %s1228_s7 = scalar_lea.vmem %s1227_s6, 4096 }
  0x5b   : > { %1018 = vmatpush3.bf16.msra.mxu0 %v1141_v1  ;;  %1072 = vmatpush3.bf16.msra.mxu1 %v1141_v1  ;;  %v1157_v17 = vld [vmem:[%s1467_s23 + $0x60] sm:$0xff]   ;;  %v1158_v18 = vld [vmem:[%s1467_s23 + $0x28] sm:$0xff]   ;;  %v1160_v20 = vld [vmem:[%s1467_s23 + $0x30] sm:$0xff]   ;;  %p1229_p10 = scmp.lt.s32.totalorder %s1516_s4, %s1227_s6  ;;  %p1230_p13 = scmp.lt.s32.totalorder %s1228_s7, %s1222_s28 }
  0x5c   : > { %1019 = vmatprep.subr.bf16.mxu0 %v1142_v2  ;;  %1065 = vmatprep.subr.bf16.mxu1 %v1142_v2  ;;  %v1159_v19 = vld [vmem:[%s1467_s23 + $0x68] sm:$0xff]   ;;  %v1161_v21 = vld [vmem:[%s1467_s23 + $0x70] sm:$0xff]   ;;  %v1162_v22 = vld [vmem:[%s1467_s23 + $0x38] sm:$0xff]   ;;  %p1225_p8 = pneg %p1224_p6 }
  0x5d   : > { %v1163_v23 = vld [vmem:[%s1467_s23 + $0x78] sm:$0xff]   ;;  %p1231_p3 = por %p1230_p13, %p1229_p10 }
  0x5f   : > { %1020 = vmatpush3.bf16.msra.mxu0 %v1142_v2  ;;  %1073 = vmatpush3.bf16.msra.mxu1 %v1142_v2  ;;  %p1232_p7 = pnand %p1231_p3, %p1225_p8 }
  0x60   : > { %1021 = vmatprep.subr.bf16.mxu0 %v1143_v3  ;;  %1066 = vmatprep.subr.bf16.mxu1 %v1143_v3 }
  0x63   : > { %1022 = vmatpush3.bf16.msra.mxu0 %v1143_v3  ;;  %1074 = vmatpush3.bf16.msra.mxu1 %v1143_v3 }
  0x64   : > { %1023 = vmatprep.subr.bf16.mxu0 %v1144_v6  ;;  %1067 = vmatprep.subr.bf16.mxu1 %v1144_v6 }
  0x67   : > { %1024 = vmatpush3.bf16.msra.mxu0 %v1144_v6  ;;  %1075 = vmatpush3.bf16.msra.mxu1 %v1144_v6 }
  0x68   : > { %1025 = vmatprep.subr.bf16.mxu0 %v1145_v7  ;;  %1068 = vmatprep.subr.bf16.mxu1 %v1145_v7 }
  0x6b   : > { %1026 = vmatpush3.bf16.msra.mxu0 %v1145_v7  ;;  %1076 = vmatpush3.bf16.msra.mxu1 %v1145_v7 }
  0x6c   : > { %1027 = vmatprep.subr.bf16.mxu0 %v1146_v8  ;;  %1069 = vmatprep.subr.bf16.mxu1 %v1146_v8 }
  0x6f   : > { %1028 = vmatpush3.bf16.msra.mxu0 %v1146_v8  ;;  %1077 = vmatpush3.bf16.msra.mxu1 %v1146_v8 }
  0x70   : > { %1029 = vmatprep.subr.bf16.mxu0 %v1147_v9  ;;  %1070 = vmatprep.subr.bf16.mxu1 %v1147_v9 }
  0x73   : > { %1030 = vmatpush3.bf16.msra.mxu0 %v1147_v9  ;;  %1078 = vmatpush3.bf16.msra.mxu1 %v1147_v9 }
  0x76   : > { %1032 = vmatmul.mubr.bf16.vlgmr.msra.gmra.mrb[0].mxu0 %v1150_v10  ;;  %1048 = vmatmul.mubr.bf16.vlgmr.msra.gmra.mrb[0].mxu1 %v1151_v11 }
  0x77   : > { %1035 = vmatprep.mubr.bf16.mxu0 %v1152_v12  ;;  %1051 = vmatprep.mubr.bf16.mxu1 %v1153_v13 }
  0x7e   : > { %1036 = vmatmul.mubr.bf16.gmra.mrb[4].mxu0 %v1154_v14  ;;  %1052 = vmatmul.mubr.bf16.gmra.mrb[4].mxu1 %v1155_v15 }
  0x7f   : > { %1039 = vmatprep.mubr.bf16.mxu0 %v1156_v16  ;;  %1055 = vmatprep.mubr.bf16.mxu1 %v1157_v17 }
  0x86   : > { %1040 = vmatmul.mubr.bf16.gmra.mrb[8].mxu0 %v1158_v18  ;;  %1056 = vmatmul.mubr.bf16.gmra.mrb[8].mxu1 %v1159_v19 }
  0x87   : > { %1043 = vmatprep.mubr.bf16.mxu0 %v1160_v20  ;;  %1059 = vmatprep.mubr.bf16.mxu1 %v1161_v21 }
  0x8e   : > { %1044 = vmatmul.mubr.bf16.gmra.mrb[12].mxu0 %v1162_v22  ;;  %1060 = vmatmul.mubr.bf16.gmra.mrb[12].mxu1 %v1163_v23 }
 0x149   : > { %v1033_v24 = vpop.f32.mrb[0].mxu0  ;;  %v1049_v25 = vpop.f32.mrb[0].mxu1 }
 0x14a   : > { %v406_v26 = vpop.f32.mrb[1].mxu0  ;;  %v470_v27 = vpop.f32.mrb[1].mxu1 }
 0x14b   : > { %v1034_v28 = vpop.f32.mrb[2].mxu0  ;;  %v1050_v29 = vpop.f32.mrb[2].mxu1 }
 0x14c   : > { %v904_v30 = vpack.c.bf16 %v1034_v28, %v1033_v24  ;;  %v944_v31 = vpack.c.bf16 %v1050_v29, %v1049_v25  ;;  %v409_v32 = vpop.f32.mrb[3].mxu0  ;;  %v473_v33 = vpop.f32.mrb[3].mxu1 }
 0x14d   : > { %v899_v34 = vpack.c.bf16 %v409_v32, %v406_v26  ;;  %v939_v35 = vpack.c.bf16 %v473_v33, %v470_v27 }
 0x14e   : > { %976 = vst [vmem:[%s1495_s15 + $0x8] sm:$0xff] %v904_v30   ;;  %984 = vst [vmem:[%s1495_s15 + $0x48] sm:$0xff] %v944_v31  }
 0x14f   : > { %900 = vst [vmem:[%s1495_s15] sm:$0xff] %v899_v34   ;;  %983 = vst [vmem:[%s1495_s15 + $0x40] sm:$0xff] %v939_v35  }
 0x151   : > { %v1037_v36 = vpop.f32.mrb[4].mxu0  ;;  %v1053_v37 = vpop.f32.mrb[4].mxu1 }
 0x152   : > { %v422_v38 = vpop.f32.mrb[5].mxu0  ;;  %v486_v39 = vpop.f32.mrb[5].mxu1 }
 0x153   : > { %v1038_v40 = vpop.f32.mrb[6].mxu0  ;;  %v1054_v41 = vpop.f32.mrb[6].mxu1 }
 0x154   : > { %v914_v42 = vpack.c.bf16 %v1038_v40, %v1037_v36  ;;  %v954_v43 = vpack.c.bf16 %v1054_v41, %v1053_v37  ;;  %v425_v44 = vpop.f32.mrb[7].mxu0  ;;  %v489_v45 = vpop.f32.mrb[7].mxu1 }
 0x155   : > { %v909_v46 = vpack.c.bf16 %v425_v44, %v422_v38  ;;  %v949_v47 = vpack.c.bf16 %v489_v45, %v486_v39 }
 0x156   : > { %978 = vst [vmem:[%s1495_s15 + $0x18] sm:$0xff] %v914_v42   ;;  %986 = vst [vmem:[%s1495_s15 + $0x58] sm:$0xff] %v954_v43  }
 0x157   : > { %977 = vst [vmem:[%s1495_s15 + $0x10] sm:$0xff] %v909_v46   ;;  %985 = vst [vmem:[%s1495_s15 + $0x50] sm:$0xff] %v949_v47  }
 0x159   : > { %v1041_v48 = vpop.f32.mrb[8].mxu0  ;;  %v1057_v49 = vpop.f32.mrb[8].mxu1 }
 0x15a   : > { %v438_v50 = vpop.f32.mrb[9].mxu0  ;;  %v502_v51 = vpop.f32.mrb[9].mxu1 }
 0x15b   : > { %v1042_v52 = vpop.f32.mrb[10].mxu0  ;;  %v1058_v53 = vpop.f32.mrb[10].mxu1 }
 0x15c   : > { %v924_v54 = vpack.c.bf16 %v1042_v52, %v1041_v48  ;;  %v964_v55 = vpack.c.bf16 %v1058_v53, %v1057_v49  ;;  %v441_v56 = vpop.f32.mrb[11].mxu0  ;;  %v505_v57 = vpop.f32.mrb[11].mxu1 }
 0x15d   : > { %v919_v58 = vpack.c.bf16 %v441_v56, %v438_v50  ;;  %v959_v59 = vpack.c.bf16 %v505_v57, %v502_v51 }
 0x15e   : > { %980 = vst [vmem:[%s1495_s15 + $0x28] sm:$0xff] %v924_v54   ;;  %988 = vst [vmem:[%s1495_s15 + $0x68] sm:$0xff] %v964_v55  }
 0x15f   : > { %979 = vst [vmem:[%s1495_s15 + $0x20] sm:$0xff] %v919_v58   ;;  %987 = vst [vmem:[%s1495_s15 + $0x60] sm:$0xff] %v959_v59  }
 0x161   : > { %v1045_v60 = vpop.f32.mrb[12].mxu0  ;;  %v1061_v61 = vpop.f32.mrb[12].mxu1 }
 0x162   : > { %v454_v62 = vpop.f32.mrb[13].mxu0  ;;  %v518_v63 = vpop.f32.mrb[13].mxu1 }
 0x163   : > { %v1046_v0 = vpop.f32.mrb[14].mxu0  ;;  %v1062_v1 = vpop.f32.mrb[14].mxu1 }
 0x164   : > { %v934_v2 = vpack.c.bf16 %v1046_v0, %v1045_v60  ;;  %v974_v3 = vpack.c.bf16 %v1062_v1, %v1061_v61  ;;  %v457_v4 = vpop.f32.mrb[15].mxu0  ;;  %v521_v5 = vpop.f32.mrb[15].mxu1 }
 0x165   : > { %v929_v6 = vpack.c.bf16 %v457_v4, %v454_v62  ;;  %v969_v7 = vpack.c.bf16 %v521_v5, %v518_v63 }
 0x166   : > { %982 = vst [vmem:[%s1495_s15 + $0x38] sm:$0xff] %v934_v2   ;;  %990 = vst [vmem:[%s1495_s15 + $0x78] sm:$0xff] %v974_v3  }
 0x167   : > { %981 = vst [vmem:[%s1495_s15 + $0x30] sm:$0xff] %v929_v6   ;;  %989 = vst [vmem:[%s1495_s15 + $0x70] sm:$0xff] %v969_v7  }
 0x168   : > { %1235 = shalt.err (!%p1232_p7)
}
 0x169   : > { %s1236_s20 = scalar_lea.hbm %s1514_s22, 2048  ;;  %s1240_s25 = scalar_lea.hbm %s1566_s2, 4096 }
 0x16a   : > { %p1237_p9 = scmp.ne.s32.totalorder %s1514_s22, %s1236_s20  ;;  %p1241_p5 = scmp.lt.u32.totalorder %s1514_s22, %s1566_s2 }
 0x16b   : > { %p1242_p11 = scmp.lt.u32.totalorder %s1240_s25, %s1236_s20  ;;  %p1244_p4 = scmp.lt.u32.totalorder %s1236_s20, %s1514_s22 }
 0x16c   : > { %p1238_p1 = pnand %p1237_p9, %p1410_p12 }
 0x16d   : > { %p1243_p2 = por %p1242_p11, %p1241_p5 }
 0x16e   : > { %p1239_p0 = pneg %p1238_p1 }
 0x16f   : > { %p1245_p6 = por %p1244_p4, %p1243_p2 }
 0x171   : > { %p1246_p8 = pnand %p1245_p6, %p1239_p0 }
 0x173   : > { %1249 = shalt.err (!%p1246_p8)
}
 0x174   : > { %s1299_s30 = smov 64   ;;  %s1300_s23 = smov 4  }
 0x175   : > { %1085 = dma.vmem_to_hbm [thread:$0]  (%p1410_p12), %s1516_s4, 2048, %s1514_s22, %s694_s13, %s1299_s30, %s1299_s30, %s1300_s23  }
 0x176 PF: > { %s722_s15 = sand.u32 1, %s1280_s9   ;;  %p1581_p10 = scmp.ne.s32.totalorder %s1571_s16, 0 }
 0x177   : > { %p1582_p13 = scmp.ge.s32.totalorder %s1292_s12, 2  ;;  %s723_s17 = scalar_lea.sflag [#allocation4], %s722_s15 }
 0x179   : > { %p1096_p3 = pnand %p1582_p13, %p1581_p10 }
 0x17b   : > { %1275 = dma.done.wait (!%p1096_p3), %s723_s17, 2048  }
 0x17c   : > { %1277 = vsyncadd (!%p1096_p3), %s723_s17, 4294965248  ;;  %p16_p7 = scmp.ge.s32.totalorder %s1372_s21, 4   ;;  %s1583_s9 = smov %s1284_s10 }
 0x17d   : > { %s1584_s10 = smov %s1288_s11  ;;  %s1585_s11 = smov %s1406_s8 }
 0x17e   : > { %s1586_s12 = smov %s1372_s21  ;;  %18 = sbr.rel (!%p16_p7) target bundleno = 6 (0x6), region = 77 }
 0x185   :  { %728 = vsyncpa [#allocation3], 1 }
 0x186   :  { %730 = vsyncpa [#allocation3 + $0x1], 1 }
 0x187   :  { %731 = vsyncpa [#allocation6], 1 }
 0x188   :  { %732 = vsyncpa [#allocation4], 1 }
 0x189   :  { %734 = vsyncpa [#allocation4 + $0x1], 1 }

</bundles_post_ra>
